<compile_context>
chip_gen: v6e
topology: v6e:2x2x1
jax: 0.10.0
libtpu: 0.0.40
codegen_flags: <defaults>
</compile_context>

<pallas_src>
import functools

import jax
import jax.numpy as jnp
from jax.experimental import pallas as pl
from jax.experimental.pallas import tpu as pltpu

_LANES = 128


def _focal_bce_sum_kernel(x_ref, t_ref, psum_ref, *, n_valid, n_padded,
                          tile_rows, lanes):
    """Accumulates per-lane partial sums of stable BCE-with-logits over the grid."""
    i = pl.program_id(0)

    @pl.when(i == 0)
    def _():
        psum_ref[...] = jnp.zeros_like(psum_ref)

    x = x_ref[...]          # (tile_rows, lanes) f32
    t = t_ref[...]          # (tile_rows, lanes) f32

    # Numerically stable BCEWithLogits per element (same formula torch uses):
    #   max(x, 0) - x*t + log(1 + exp(-|x|))
    bce = jnp.maximum(x, 0.0) - x * t + jnp.log1p(jnp.exp(-jnp.abs(x)))

    if n_padded != n_valid:  # static: mask only emitted when padding exists
        row = jax.lax.broadcasted_iota(jnp.int32, (tile_rows, lanes), 0) \
              + i * tile_rows
        lane = jax.lax.broadcasted_iota(jnp.int32, (tile_rows, lanes), 1)
        flat = row * lanes + lane
        bce = jnp.where(flat < n_valid, bce, 0.0)

    # Sublane-only reduce -> lane-dense (1, 128) partial sums, accumulated
    # into the resident output block across the grid.
    psum_ref[...] += jnp.sum(bce, axis=0, keepdims=True)


def focal_loss(inputs, targets, alpha=1.0, gamma=2.0, reduce=True,
               tile_rows=1024):
    """Focal loss matching the PyTorch FocalLoss module. Returns a scalar."""
    x = jnp.asarray(inputs, jnp.float32).reshape(-1)
    t = jnp.asarray(targets, jnp.float32).reshape(-1)
    n = int(x.shape[0])

    rows = pl.cdiv(n, _LANES)
    # Tile rows: multiple of 8, clamped so tiny inputs don't over-pad.
    tile_rows = max(8, min(int(tile_rows), 8 * pl.cdiv(rows, 8)))
    rows_padded = tile_rows * pl.cdiv(rows, tile_rows)
    n_padded = rows_padded * _LANES

    pad = n_padded - n
    if pad:
        x = jnp.pad(x, (0, pad))
        t = jnp.pad(t, (0, pad))
    x = x.reshape(rows_padded, _LANES)
    t = t.reshape(rows_padded, _LANES)

    grid = (rows_padded // tile_rows,)

    kernel = functools.partial(
        _focal_bce_sum_kernel,
        n_valid=n, n_padded=n_padded, tile_rows=tile_rows, lanes=_LANES)

    cost = pl.CostEstimate(
        flops=8 * n_padded,
        transcendentals=2 * n_padded,
        bytes_accessed=2 * n_padded * 4 + _LANES * 4,
    )

    partial_sums = pl.pallas_call(
        kernel,
        out_shape=jax.ShapeDtypeStruct((1, _LANES), jnp.float32),
        grid=grid,
        in_specs=[
            pl.BlockSpec((tile_rows, _LANES), lambda i: (i, 0)),
            pl.BlockSpec((tile_rows, _LANES), lambda i: (i, 0)),
        ],
        out_specs=pl.BlockSpec((1, _LANES), lambda i: (0, 0)),
        compiler_params=pltpu.CompilerParams(
            dimension_semantics=("arbitrary",)),
        cost_estimate=cost,
    )(x, t)

    # O(1) epilogue: finish the mean and the focal transform on a scalar.
    bce_mean = jnp.sum(partial_sums) / jnp.float32(n)
    pt = jnp.exp(-bce_mean)
    f_loss = alpha * (1.0 - pt) ** gamma * bce_mean
    # reduce=True -> mean over a scalar is the scalar itself.
    # TODO(synk): the original module returns None when reduce=False; we return
    # the scalar in both cases.
    return f_loss


def _focal_ref(x, t, alpha=1.0, gamma=2.0):
    """Pure-JAX reference (same math as torch BCEWithLogitsLoss + focal transform)."""
    x = jnp.asarray(x, jnp.float32)
    t = jnp.asarray(t, jnp.float32)
    bce = jnp.mean(jnp.maximum(x, 0.0) - x * t + jnp.log1p(jnp.exp(-jnp.abs(x))))
    pt = jnp.exp(-bce)
    return alpha * (1.0 - pt) ** gamma * bce


if __name__ == "__main__":
    key = jax.random.PRNGKey(0)
    k1, k2, k3, k4 = jax.random.split(key, 4)

    # Case 1: lane-aligned dense-prediction-style logits, (B=2, C=4, H=W=16).
    shape1 = (2, 4, 16, 16)
    logits1 = jax.random.normal(k1, shape1, dtype=jnp.float32)
    targets1 = (jax.random.uniform(k2, shape1) < 0.3).astype(jnp.float32)

    loss1 = focal_loss(logits1, targets1, alpha=1.0, gamma=2.0)
    jax.block_until_ready(loss1)
    ref1 = _focal_ref(logits1, targets1, alpha=1.0, gamma=2.0)
    assert jnp.allclose(loss1, ref1, rtol=1e-5, atol=1e-5), (loss1, ref1)

    # Case 2: ragged shape (exercises the in-kernel padding mask).
    shape2 = (3, 5, 7)
    logits2 = jax.random.normal(k3, shape2, dtype=jnp.float32)
    targets2 = (jax.random.uniform(k4, shape2) < 0.5).astype(jnp.float32)

    loss2 = focal_loss(logits2, targets2, alpha=0.5, gamma=2.0)
    jax.block_until_ready(loss2)
    ref2 = _focal_ref(logits2, targets2, alpha=0.5, gamma=2.0)
    assert jnp.allclose(loss2, ref2, rtol=1e-5, atol=1e-5), (loss2, ref2)

    print("KERNEL_OK")
</pallas_src>

<mosaic_0001>
module attributes {stable_mosaic.version = 11 : i64} {
  func.func @_focal_bce_sum_kernel(%arg0: i32, %arg1: memref<16x128xf32, #tpu.memory_space<vmem>>, %arg2: memref<16x128xf32, #tpu.memory_space<vmem>>, %arg3: memref<1x128xf32, #tpu.memory_space<vmem>>) attributes {dimension_semantics = [#tpu.dimension_semantics<arbitrary>], iteration_bounds = array<i64: 1>, scalar_prefetch = 0 : i64, scratch_operands = 0 : i64, tpu.core_type = #tpu.core_type<tc>, window_params = [{transform_indices = @transform_0, window_bounds = array<i64: 16, 128>}, {transform_indices = @transform_1, window_bounds = array<i64: 16, 128>}, {pipeline_mode = #tpu.pipeline_mode<synchronous>, transform_indices = @transform_2, window_bounds = array<i64: 1, 128>}]} {
    %c0_i32 = arith.constant 0 : i32
    %0 = arith.cmpi eq, %arg0, %c0_i32 : i32
    %1 = arith.extui %0 : i1 to i32
    %c0_i32_0 = arith.constant 0 : i32
    %2 = arith.cmpi ne, %1, %c0_i32_0 : i32
    scf.if %2 {
      %cst_10 = arith.constant 0.000000e+00 : f32
      %20 = vector.broadcast %cst_10 : f32 to vector<1x128xf32>
      %c0_11 = arith.constant 0 : index
      %c0_12 = arith.constant 0 : index
      %21 = vector.load %arg3[%c0_11, %c0_12] : memref<1x128xf32, #tpu.memory_space<vmem>>, vector<1x128xf32>
      tpu.vector_store %arg3[%c0_11, %c0_12], %20 {strides = array<i32>} : memref<1x128xf32, #tpu.memory_space<vmem>>, vector<1x128xf32>,
    } else {
    }
    %c0 = arith.constant 0 : index
    %c0_1 = arith.constant 0 : index
    %3 = vector.load %arg1[%c0, %c0_1] : memref<16x128xf32, #tpu.memory_space<vmem>>, vector<16x128xf32>
    %c0_2 = arith.constant 0 : index
    %c0_3 = arith.constant 0 : index
    %4 = vector.load %arg2[%c0_2, %c0_3] : memref<16x128xf32, #tpu.memory_space<vmem>>, vector<16x128xf32>
    %cst = arith.constant 0.000000e+00 : f32
    %5 = vector.broadcast %cst : f32 to vector<16x128xf32>
    %6 = arith.maximumf %3, %5 : vector<16x128xf32>
    %7 = arith.mulf %3, %4 : vector<16x128xf32>
    %8 = arith.subf %6, %7 : vector<16x128xf32>
    %9 = math.absf %3 : vector<16x128xf32>
    %cst_4 = arith.constant 0.000000e+00 : f32
    %10 = vector.broadcast %cst_4 : f32 to vector<16x128xf32>
    %11 = arith.subf %10, %9 : vector<16x128xf32>
    %12 = math.exp %11 : vector<16x128xf32>
    %13 = math.log1p %12 : vector<16x128xf32>
    %14 = arith.addf %8, %13 : vector<16x128xf32>
    %c0_5 = arith.constant 0 : index
    %c0_6 = arith.constant 0 : index
    %15 = vector.load %arg3[%c0_5, %c0_6] : memref<1x128xf32, #tpu.memory_space<vmem>>, vector<1x128xf32>
    %cst_7 = arith.constant dense<0.000000e+00> : vector<128xf32>
    %16 = vector.multi_reduction <add>, %14, %cst_7 [0] : vector<16x128xf32> to vector<128xf32>
    %17 = vector.shape_cast %16 : vector<128xf32> to vector<1x128xf32>
    %18 = arith.addf %15, %17 : vector<1x128xf32>
    %c0_8 = arith.constant 0 : index
    %c0_9 = arith.constant 0 : index
    %19 = vector.load %arg3[%c0_8, %c0_9] : memref<1x128xf32, #tpu.memory_space<vmem>>, vector<1x128xf32>
    tpu.vector_store %arg3[%c0_8, %c0_9], %18 {strides = array<i32>} : memref<1x128xf32, #tpu.memory_space<vmem>>, vector<1x128xf32>,
    return
  }
  func.func @transform_0(%arg0: i32) -> (i32, i32) {
    %c0_i32 = arith.constant 0 : i32
    %c0_i32_0 = arith.constant 0 : i32
    return %arg0, %c0_i32 : i32, i32
  }
  func.func @transform_1(%arg0: i32) -> (i32, i32) {
    %c0_i32 = arith.constant 0 : i32
    %c0_i32_0 = arith.constant 0 : i32
    return %arg0, %c0_i32 : i32, i32
  }
  func.func @transform_2(%arg0: i32) -> (i32, i32) {
    %c0_i32 = arith.constant 0 : i32
    %c0_i32_0 = arith.constant 0 : i32
    %c0_i32_1 = arith.constant 0 : i32
    return %c0_i32, %c0_i32_0 : i32, i32
  }
}

</mosaic_0001>

<bundles_post_ra>
// kernel: tpu_custom_call.1
= control target key start
LH: loop header
LB: loop body
LE: loop exit
PB: predicated region body
PF: predicated region fallthrough
CT: control target
= control target key end

     0   :  { %7 = vsyncpa [#allocation3], 0  ;;  %s219_s0 = inlined_call_operand.hbm [shape: f32[16,128], index: 0, kind: input, shape index: {}]   ;;  %s220_s1 = inlined_call_operand.hbm [shape: f32[16,128], index: 1, kind: input, shape index: {}]   ;;  %s221_s2 = inlined_call_operand.hbm [shape: f32[1,128], index: 2, kind: output, shape index: {}]  }
   0x1   :  { %8 = vsyncpa [#allocation6], 0 }
   0x2   :  { %9 = vsyncpa [#allocation4], 0  ;;  %s189_s9 = smov [#allocation2]  }
   0x3   :  { %s15_s10 = sshll.u32 %s189_s9, 4  ;;  %s16_s10 = int_to_ptr.vmem [resolvable:$true] %s15_s10 }
   0x4   :  { %s131_s11 = scalar_lea.vmem %s16_s10, 256  ;;  %p136_p1 = scmp.lt.s32.totalorder %s16_s10, %s16_s10 }
   0x5   :  { %p132_p0 = scmp.ne.s32.totalorder %s16_s10, %s131_s11  ;;  %p137_p2 = scmp.lt.s32.totalorder %s131_s11, %s131_s11 }
   0x7   :  { %p138_p3 = por %p137_p2, %p136_p1 }
   0x9   :  { %p139_p4 = pnand %p138_p3, %p132_p0 }
   0xb   :  { %142 = shalt.err (!%p139_p4)
}
   0xc   :  { %s190_s12 = smov 128   ;;  %s191_s13 = smov 8  }
   0xd   :  { %21 = dma.hbm_to_vmem [thread:$0]  %s219_s0, 256, %s16_s10, [#allocation3], %s190_s12, %s190_s12, %s191_s13  }
   0xe   :  { %s192_s16 = smov [#allocation5]  }
   0xf   :  { %s27_s17 = sshll.u32 %s192_s16, 4  ;;  %s28_s17 = int_to_ptr.vmem [resolvable:$true] %s27_s17 }
  0x10   :  { %s151_s18 = scalar_lea.vmem %s28_s17, 256  ;;  %p156_p6 = scmp.lt.s32.totalorder %s28_s17, %s28_s17 }
  0x11   :  { %p152_p5 = scmp.ne.s32.totalorder %s28_s17, %s151_s18  ;;  %p157_p7 = scmp.lt.s32.totalorder %s151_s18, %s151_s18 }
  0x13   :  { %p158_p8 = por %p157_p7, %p156_p6 }
  0x15   :  { %p159_p9 = pnand %p158_p8, %p152_p5 }
  0x17   :  { %162 = shalt.err (!%p159_p9)
}
  0x18   :  { %33 = dma.hbm_to_vmem [thread:$0]  %s220_s1, 256, %s28_s17, [#allocation6], %s190_s12, %s190_s12, %s191_s13  }
  0x19   :  { %183 = dma.done.wait [#allocation3], 256  }
  0x1a   :  { %184 = vsyncadd [#allocation3], 4294967040 }
  0x1b   :  { %185 = dma.done.wait [#allocation6], 256  }
  0x1c   :  { %186 = vsyncadd [#allocation6], 4294967040  ;;  %v193_v0 = vmov 0.0   ;;  %v45_v1 = vld [vmem:[#allocation2] sm:$0xff]  ;;  %v46_v2 = vld [vmem:[#allocation2 + $0x8] sm:$0xff]  ;;  %s194_s0 = smov [#allocation7]  }
  0x1d   :  { %44 = vst [vmem:[#allocation7] sm:$0x1] %v193_v0  ;;  %v55_v3 = vand.u32 2147483647, %v45_v1  ;;  %v56_v4 = vand.u32 2147483647, %v46_v2 }
  0x1e   :  { %v47_v15 = vld [vmem:[#allocation5] sm:$0xff]  ;;  %v48_v16 = vld [vmem:[#allocation5 + $0x8] sm:$0xff]  ;;  %v49_v18 = vmax.f32 %v45_v1, 0.0  ;;  %v50_v22 = vmax.f32 %v46_v2, 0.0  ;;  %s99_s1 = sshll.u32 %s194_s0, 4  ;;  %s100_s1 = int_to_ptr.vmem [resolvable:$true] %s99_s1 }
  0x1f   :  { %v57_v5 = vsub.f32 0.0, %v55_v3  ;;  %v58_v6 = vsub.f32 0.0, %v56_v4  ;;  %v51_v19 = vmul.f32 %v47_v15, %v45_v1  ;;  %v52_v23 = vmul.f32 %v48_v16, %v46_v2  ;;  %s163_s21 = scalar_lea.vmem %s100_s1, 16  ;;  %s167_s22 = scalar_lea.vmem %s100_s1, 32 }
  0x20   :  { %p164_p10 = scmp.ne.s32.totalorder %s100_s1, %s163_s21  ;;  %p168_p11 = scmp.lt.s32.totalorder %s100_s1, %s100_s1 }
  0x21   :  { %v59_v7 = vmul.f32 1.442695, %v57_v5  ;;  %v61_v8 = vmul.f32 1.442695, %v58_v6  ;;  %v53_v27 = vsub.f32 %v49_v18, %v51_v19  ;;  %v54_v30 = vsub.f32 %v50_v22, %v52_v23  ;;  %p169_p12 = scmp.lt.s32.totalorder %s167_s22, %s163_s21 }
  0x23   :  { %115 = vpow2.f32 %v59_v7  ;;  %p170_p13 = por %p169_p12, %p168_p11 }
  0x24   :  { %117 = vpow2.f32 %v61_v8  ;;  %v83_v43 = vld [vmem:[#allocation7] sm:$0x1] }
  0x25   :  { %p171_p0 = pnand %p170_p13, %p164_p10 }
  0x30   :  { %v116_v9 = vpop.eup %115 }
  0x31   :  { %v118_v10 = vpop.eup %117  ;;  %v63_v11 = vadd.f32 1.0, %v116_v9  ;;  %v66_v13 = vmul.f32 -0.5, %v116_v9  ;;  %v69_v20 = vand.u32 2147483647, %v116_v9 }
  0x32   :  { %v72_v12 = vadd.f32 1.0, %v118_v10  ;;  %v75_v14 = vmul.f32 -0.5, %v118_v10  ;;  %v78_v24 = vand.u32 2147483647, %v118_v10 }
  0x33   :  { %119 = vlog2.f32 %v63_v11  ;;  %v67_v17 = vadd.f32 1.0, %v66_v13  ;;  %vm70_vm0 = vcmp.lt.f32.partialorder %v69_v20, 0.0004427343 }
  0x34   :  { %121 = vlog2.f32 %v72_v12  ;;  %v76_v21 = vadd.f32 1.0, %v75_v14  ;;  %vm79_vm1 = vcmp.lt.f32.partialorder %v78_v24, 0.0004427343 }
  0x35   :  { %v68_v25 = vmul.f32 %v116_v9, %v67_v17 }
  0x36   :  { %v77_v28 = vmul.f32 %v118_v10, %v76_v21 }
  0x40   :  { %v120_v26 = vpop.eup %119 }
  0x41   :  { %v122_v29 = vpop.eup %121  ;;  %v65_v31 = vmul.f32 0.6931472, %v120_v26 }
  0x42   :  { %v74_v32 = vmul.f32 0.6931472, %v122_v29 }
  0x43   :  { %v71_v33 = vsel %vm70_vm0, %v68_v25, %v65_v31 }
  0x44   :  { %v80_v34 = vsel %vm79_vm1, %v77_v28, %v74_v32  ;;  %v81_v35 = vadd.f32 %v71_v33, %v53_v27 }
  0x45   :  { %v82_v36 = vadd.f32 %v80_v34, %v54_v30 }
  0x47   :  { %v84_v37 = vadd.f32 %v82_v36, %v81_v35 }
  0x49   :  { %v85_v38 = vrot.slane %v84_v37, 4 }
  0x4b   :  { %v86_v39 = vadd.f32 %v85_v38, %v84_v37 }
  0x4d   :  { %v87_v40 = vrot.slane %v86_v39, 2 }
  0x4f   :  { %v88_v41 = vadd.f32 %v87_v40, %v86_v39 }
  0x51   :  { %v89_v42 = vrot.slane %v88_v41, 1 }
  0x53   :  { %v90_v44 = vadd.f32 %v89_v42, %v88_v41 }
  0x55   :  { %v91_v45 = vadd.f32 %v90_v44, %v83_v43 }
  0x57   :  { %92 = vst [vmem:[#allocation7] sm:$0x1] %v91_v45 }
  0x58   :  { %174 = shalt.err (!%p171_p0)
}
  0x59   :  { %102 = dma.vmem_to_hbm [thread:$0]  %s100_s1, 16, %s221_s2, [#allocation4]  }
  0x5a   :  { %187 = dma.done.wait [#allocation4], 16  }
  0x5b   :  { %188 = vsyncadd [#allocation4], 4294967280 }
  0x5c   :  { %106 = vsyncpa [#allocation3], 1 }
  0x5d   :  { %107 = vsyncpa [#allocation6], 1 }
  0x5e   :  { %108 = vsyncpa [#allocation4], 1 }

</bundles_post_ra>
